<compile_context>
chip_gen: v5e
topology: v5e:2x2
jax: 0.10.0
libtpu: 0.0.40
codegen_flags: <defaults>
</compile_context>

<pallas_src>
import functools

import jax
import jax.numpy as jnp
from jax.experimental import pallas as pl
from jax.experimental.pallas import tpu as pltpu


def _round_up(x, m):
    return (x + m - 1) // m * m


def _linear_kernel(ids_ref, emb_ref, dense_ref, w_ref, out_ref, *, n_sparse):
    """One batch tile of the linear logit.

    ids_ref   : [TB, n_sparse] int32 -- ids already offset into the
                                        concatenated embedding table
    emb_ref   : [1, V_pad]     f32   -- lane-dense concatenated linear tables
    dense_ref : [TB, D_dense]  f32   -- concatenated dense feature values
    w_ref     : [1, D_dense]   f32   -- dense linear weight (lane-dense row)
    out_ref   : [TB, 1]        f32
    """
    ids = ids_ref[...]                      # [TB, n_sparse]
    emb = emb_ref[...]                      # [1, V_pad]
    tb = ids.shape[0]
    v_pad = emb.shape[1]

    # Per-feature 2-D one-hot accumulation (no 3-D intermediate). The loop is
    # a static unroll over the (tiny) number of sparse features.
    iota = jax.lax.broadcasted_iota(jnp.int32, (tb, v_pad), 1)
    multihot = jnp.zeros((tb, v_pad), jnp.float32)
    for f in range(n_sparse):
        multihot = multihot + (ids[:, f:f + 1] == iota).astype(jnp.float32)

    # VPU multiply + lane (XLU) reduction instead of N=1 MXU matmuls.
    sparse_logit = jnp.sum(multihot * emb, axis=-1, keepdims=True)              # [TB, 1]
    dense_logit = jnp.sum(dense_ref[...] * w_ref[...], axis=-1, keepdims=True)  # [TB, 1]

    out_ref[...] = sparse_logit + dense_logit


@functools.partial(jax.jit, static_argnames=("n_sparse", "dense_dims", "vocab_sizes"))
def linear_forward(X, emb_table, dense_weight, *, n_sparse, dense_dims, vocab_sizes):
    """Slice X into sparse ids / dense values, repack params lane-dense, call the kernel."""
    B = X.shape[0]
    d_dense = sum(dense_dims)
    v_total = sum(vocab_sizes)

    # Sparse id columns (first n_sparse columns), offset into the concatenated table.
    sparse_ids = X[:, :n_sparse].astype(jnp.int32)                     # [B, n_sparse]
    offsets = jnp.asarray(
        [sum(vocab_sizes[:i]) for i in range(n_sparse)], dtype=jnp.int32)
    sparse_ids = sparse_ids + offsets[None, :]

    # Dense value columns follow the sparse id columns.
    dense_vals = X[:, n_sparse:n_sparse + d_dense].astype(jnp.float32)  # [B, D_dense]

    # Lane-dense parameter layouts.
    v_pad = _round_up(v_total, 128)
    emb_row = jnp.zeros((1, v_pad), jnp.float32).at[0, :v_total].set(emb_table[:, 0])
    w_row = dense_weight.reshape(1, d_dense)

    # Batch tiling. Multi-tile TB is 128-aligned and bounded so the [TB, V_pad]
    # one-hot intermediate stays ~<= 4 MiB of VMEM.
    tb_target = 512
    max_tb = max(128, ((4 * 1024 * 1024) // (v_pad * 4)) // 128 * 128)
    tb_target = min(tb_target, max_tb)
    if B <= tb_target:
        tb = _round_up(B, 8)
        b_pad = tb
    else:
        tb = tb_target
        b_pad = _round_up(B, tb)
    grid = (b_pad // tb,)

    if b_pad != B:   # ragged last tile: pad with zero rows, sliced off after the call
        pad = b_pad - B
        sparse_ids = jnp.pad(sparse_ids, ((0, pad), (0, 0)))
        dense_vals = jnp.pad(dense_vals, ((0, pad), (0, 0)))

    kernel = functools.partial(_linear_kernel, n_sparse=n_sparse)
    out = pl.pallas_call(
        kernel,
        out_shape=jax.ShapeDtypeStruct((b_pad, 1), jnp.float32),
        grid_spec=pltpu.PrefetchScalarGridSpec(
            num_scalar_prefetch=0,
            grid=grid,
            in_specs=[
                pl.BlockSpec((tb, n_sparse), lambda i: (i, 0)),   # per-tile ids
                pl.BlockSpec((1, v_pad), lambda i: (0, 0)),       # resident table row
                pl.BlockSpec((tb, d_dense), lambda i: (i, 0)),    # per-tile dense vals
                pl.BlockSpec((1, d_dense), lambda i: (0, 0)),     # resident weight row
            ],
            out_specs=pl.BlockSpec((tb, 1), lambda i: (i, 0)),
        ),
        compiler_params=pltpu.CompilerParams(
            dimension_semantics=("parallel",),
            vmem_limit_bytes=32 * 1024 * 1024,
        ),
    )(sparse_ids, emb_row, dense_vals, w_row)
    return out[:B]


def _reference(X, emb_table, dense_weight, *, n_sparse, dense_dims, vocab_sizes):
    """Pure-JAX reference (same math as the PyTorch forward)."""
    d_dense = sum(dense_dims)
    offs = jnp.asarray([sum(vocab_sizes[:i]) for i in range(n_sparse)], jnp.int32)
    sid = X[:, :n_sparse].astype(jnp.int32) + offs[None, :]
    sparse = jnp.take(emb_table[:, 0], sid, axis=0).sum(-1, keepdims=True)
    dense = X[:, n_sparse:n_sparse + d_dense] @ dense_weight
    return sparse + dense


def _make_inputs(key, batch, vocab_sizes, dense_dims):
    k_ids, k_dense = jax.random.split(key)
    ids = jnp.concatenate(
        [jax.random.randint(jax.random.fold_in(k_ids, i), (batch, 1), 0, v)
         for i, v in enumerate(vocab_sizes)], axis=1).astype(jnp.float32)
    dense_vals = jax.random.normal(k_dense, (batch, sum(dense_dims)), jnp.float32)
    return jnp.concatenate([ids, dense_vals], axis=1)


if __name__ == "__main__":
    # ---- synthetic feature-column config (mirrors the PyTorch __init__) ----
    init_std = 0.0001
    vocab_sizes = (7, 5, 11)        # three SparseFeat, linear embedding dim = 1
    dense_dims = (1, 3)             # two DenseFeat -> weight shape [4, 1]
    n_sparse = len(vocab_sizes)
    d_dense = sum(dense_dims)
    v_total = sum(vocab_sizes)

    key = jax.random.PRNGKey(0)
    k_emb, k_w, k_x1, k_x2 = jax.random.split(key, 4)

    # Parameters: normal(0, init_std), like nn.init.normal_ in the module.
    emb_table = init_std * jax.random.normal(k_emb, (v_total, 1), jnp.float32)
    dense_weight = init_std * jax.random.normal(k_w, (d_dense, 1), jnp.float32)

    ok = True
    # Small batch (single tile) and a larger batch (multi-tile, ragged last tile).
    for k_x, batch in ((k_x1, 8), (k_x2, 600)):
        X = _make_inputs(k_x, batch, vocab_sizes, dense_dims)
        out = linear_forward(
            X, emb_table, dense_weight,
            n_sparse=n_sparse, dense_dims=dense_dims, vocab_sizes=vocab_sizes)
        out = jax.block_until_ready(out)
        ref = _reference(
            X, emb_table, dense_weight,
            n_sparse=n_sparse, dense_dims=dense_dims, vocab_sizes=vocab_sizes)
        ok = ok and (out.shape == (batch, 1)) and bool(jnp.allclose(out, ref, atol=1e-6))

    assert ok, "mismatch vs reference"
    print("KERNEL_OK")
</pallas_src>

<mosaic_0001>
module attributes {stable_mosaic.version = 11 : i64} {
  func.func @_linear_kernel(%arg0: i32, %arg1: memref<8x3xi32, #tpu.memory_space<vmem>>, %arg2: memref<1x128xf32, #tpu.memory_space<vmem>>, %arg3: memref<8x4xf32, #tpu.memory_space<vmem>>, %arg4: memref<1x4xf32, #tpu.memory_space<vmem>>, %arg5: memref<8x1xf32, #tpu.memory_space<vmem>>) attributes {dimension_semantics = [#tpu.dimension_semantics<parallel>], iteration_bounds = array<i64: 1>, scalar_prefetch = 0 : i64, scratch_operands = 0 : i64, tpu.core_type = #tpu.core_type<tc>, window_params = [{transform_indices = @transform_0, window_bounds = array<i64: 8, 3>}, {pipeline_mode = #tpu.pipeline_mode<synchronous>, transform_indices = @transform_1, window_bounds = array<i64: 1, 128>}, {transform_indices = @transform_2, window_bounds = array<i64: 8, 4>}, {pipeline_mode = #tpu.pipeline_mode<synchronous>, transform_indices = @transform_3, window_bounds = array<i64: 1, 4>}, {transform_indices = @transform_4, window_bounds = array<i64: 8, 1>}]} {
    %c0 = arith.constant 0 : index
    %c0_0 = arith.constant 0 : index
    %0 = vector.load %arg1[%c0, %c0_0] : memref<8x3xi32, #tpu.memory_space<vmem>>, vector<8x3xi32>
    %c0_1 = arith.constant 0 : index
    %c0_2 = arith.constant 0 : index
    %1 = vector.load %arg2[%c0_1, %c0_2] : memref<1x128xf32, #tpu.memory_space<vmem>>, vector<1x128xf32>
    %2 = tpu.iota {dimensions = array<i32: 1>} : vector<8x128xi32>
    %cst = arith.constant 0.000000e+00 : f32
    %3 = vector.broadcast %cst : f32 to vector<8x128xf32>
    %4 = vector.extract_strided_slice %0 {offsets = [0, 0], sizes = [8, 1], strides = [1, 1]} : vector<8x3xi32> to vector<8x1xi32>
    %5 = vector.broadcast %4 : vector<8x1xi32> to vector<8x128xi32>
    %6 = arith.cmpi eq, %5, %2 : vector<8x128xi32>
    %7 = arith.extui %6 : vector<8x128xi1> to vector<8x128xi32>
    %8 = arith.sitofp %7 : vector<8x128xi32> to vector<8x128xf32>
    %9 = arith.addf %3, %8 : vector<8x128xf32>
    %10 = vector.extract_strided_slice %0 {offsets = [0, 1], sizes = [8, 1], strides = [1, 1]} : vector<8x3xi32> to vector<8x1xi32>
    %11 = vector.broadcast %10 : vector<8x1xi32> to vector<8x128xi32>
    %12 = arith.cmpi eq, %11, %2 : vector<8x128xi32>
    %13 = arith.extui %12 : vector<8x128xi1> to vector<8x128xi32>
    %14 = arith.sitofp %13 : vector<8x128xi32> to vector<8x128xf32>
    %15 = arith.addf %9, %14 : vector<8x128xf32>
    %16 = vector.extract_strided_slice %0 {offsets = [0, 2], sizes = [8, 1], strides = [1, 1]} : vector<8x3xi32> to vector<8x1xi32>
    %17 = vector.broadcast %16 : vector<8x1xi32> to vector<8x128xi32>
    %18 = arith.cmpi eq, %17, %2 : vector<8x128xi32>
    %19 = arith.extui %18 : vector<8x128xi1> to vector<8x128xi32>
    %20 = arith.sitofp %19 : vector<8x128xi32> to vector<8x128xf32>
    %21 = arith.addf %15, %20 : vector<8x128xf32>
    %22 = vector.broadcast %1 : vector<1x128xf32> to vector<8x128xf32>
    %23 = arith.mulf %21, %22 : vector<8x128xf32>
    %cst_3 = arith.constant dense<0.000000e+00> : vector<8xf32>
    %24 = vector.multi_reduction <add>, %23, %cst_3 [1] : vector<8x128xf32> to vector<8xf32>
    %25 = vector.shape_cast %24 : vector<8xf32> to vector<8x1xf32>
    %c0_4 = arith.constant 0 : index
    %c0_5 = arith.constant 0 : index
    %26 = vector.load %arg3[%c0_4, %c0_5] : memref<8x4xf32, #tpu.memory_space<vmem>>, vector<8x4xf32>
    %c0_6 = arith.constant 0 : index
    %c0_7 = arith.constant 0 : index
    %27 = vector.load %arg4[%c0_6, %c0_7] : memref<1x4xf32, #tpu.memory_space<vmem>>, vector<1x4xf32>
    %28 = vector.broadcast %27 : vector<1x4xf32> to vector<8x4xf32>
    %29 = arith.mulf %26, %28 : vector<8x4xf32>
    %cst_8 = arith.constant dense<0.000000e+00> : vector<8xf32>
    %30 = vector.multi_reduction <add>, %29, %cst_8 [1] : vector<8x4xf32> to vector<8xf32>
    %31 = vector.shape_cast %30 : vector<8xf32> to vector<8x1xf32>
    %32 = arith.addf %25, %31 : vector<8x1xf32>
    %c0_9 = arith.constant 0 : index
    %c0_10 = arith.constant 0 : index
    %33 = vector.load %arg5[%c0_9, %c0_10] : memref<8x1xf32, #tpu.memory_space<vmem>>, vector<8x1xf32>
    tpu.vector_store %arg5[%c0_9, %c0_10], %32 {strides = array<i32>} : memref<8x1xf32, #tpu.memory_space<vmem>>, vector<8x1xf32>,
    return
  }
  func.func @transform_0(%arg0: i32) -> (i32, i32) {
    %c0_i32 = arith.constant 0 : i32
    %c0_i32_0 = arith.constant 0 : i32
    return %arg0, %c0_i32 : i32, i32
  }
  func.func @transform_1(%arg0: i32) -> (i32, i32) {
    %c0_i32 = arith.constant 0 : i32
    %c0_i32_0 = arith.constant 0 : i32
    %c0_i32_1 = arith.constant 0 : i32
    return %c0_i32, %c0_i32_0 : i32, i32
  }
  func.func @transform_2(%arg0: i32) -> (i32, i32) {
    %c0_i32 = arith.constant 0 : i32
    %c0_i32_0 = arith.constant 0 : i32
    return %arg0, %c0_i32 : i32, i32
  }
  func.func @transform_3(%arg0: i32) -> (i32, i32) {
    %c0_i32 = arith.constant 0 : i32
    %c0_i32_0 = arith.constant 0 : i32
    %c0_i32_1 = arith.constant 0 : i32
    return %c0_i32, %c0_i32_0 : i32, i32
  }
  func.func @transform_4(%arg0: i32) -> (i32, i32) {
    %c0_i32 = arith.constant 0 : i32
    %c0_i32_0 = arith.constant 0 : i32
    return %arg0, %c0_i32 : i32, i32
  }
}

</mosaic_0001>

<bundles_post_ra>
// kernel: linear_forward.1
= control target key start
LH: loop header
LB: loop body
LE: loop exit
PB: predicated region body
PF: predicated region fallthrough
CT: control target
= control target key end

     0   :  { %v78_v0 = vmov 0   ;;  %v79_v2 = vmov 2   ;;  %v80_v3 = vmov 1   ;;  %vm54_vm0 = vcmask 31744   ;;  %s122_s0 = inlined_call_operand.vmem [shape: s32[8,3], index: 0, kind: input, shape index: {}]   ;;  %s123_s3 = inlined_call_operand.vmem [shape: f32[1,4], index: 3, kind: input, shape index: {}]   ;;  %s124_s1 = inlined_call_operand.vmem [shape: f32[1,128], index: 1, kind: input, shape index: {}]   ;;  %s125_s2 = inlined_call_operand.vmem [shape: f32[8,4], index: 2, kind: input, shape index: {}]   ;;  %s126_s4 = inlined_call_operand.vmem [shape: f32[8,1], index: 4, kind: output, shape index: {}]  }
   0x1   :  { %72 = vset.pattern.permute.xlu0 %v78_v0  ;;  %v17_v1 = vld [vmem:[%s122_s0] sm:$0xff]  ;;  %74 = vset.pattern.permute.xlu1 %v79_v2  ;;  %v19_v8 = vlaneseq  ;;  %v81_v13 = vmov 0.0   ;;  %vm59_vm4 = vcmask 7168  }
   0x2   :  { %22 = vperm.xlu0 %72, %v17_v1   ;;  %36 = vperm.xlu1 %74, %v17_v1   ;;  %v76_v4 = vld [vmem:[%s123_s3] ss:$0 sm:$0xff] }
   0x3   :  { %v48_v5 = vld [vmem:[%s125_s2] sm:$0xff]  ;;  %v20_v10 = vand.u32 127, %v19_v8 }
   0x4   :  { %v53_v6 = vmul.f32 %v76_v4, %v48_v5  ;;  %v77_v18 = vld [vmem:[%s124_s1] ss:$0 sm:$0xff] }
   0x6   :  { %v55_v7 = vsel %vm54_vm0, %v53_v6, 0.0 }
   0x7   :  { %56 = vadd.xlane.f32.xlu2 %v55_v7 }
   0xa   :  { %73 = vset.pattern.permute.xlu0 %v80_v3 }
   0xb   :  { %29 = vperm.xlu0 %73, %v17_v1  }
  0x13   :  { %75 = vset.pattern.permute.xlu0 %v79_v2 }
  0x74   :  { %v23_v9 = vpop.permute.xlu0 %22  ;;  %v37_v11 = vpop.permute.xlu1 %36 }
  0x75   :  { %vm24_vm1 = vcmp.eq.s32.totalorder %v23_v9, %v20_v10  ;;  %vm38_vm2 = vcmp.eq.s32.totalorder %v37_v11, %v20_v10 }
  0x76   :  { %v65_v14 = vsel %vm24_vm1, 1.0, %v81_v13  ;;  %v67_v16 = vsel %vm38_vm2, 1.0, %v81_v13 }
  0x7a   :  { %v57_v21 = vpop.xlane.xlu2 %56 }
  0x7d   :  { %v30_v12 = vpop.permute.xlu0 %29 }
  0x7e   :  { %vm31_vm3 = vcmp.eq.s32.totalorder %v30_v12, %v20_v10 }
  0x7f   :  { %v66_v15 = vsel %vm31_vm3, 1.0, %v81_v13 }
  0x80   :  { %v34_v17 = vadd.f32 %v66_v15, %v65_v14 }
  0x82   :  { %v41_v19 = vadd.f32 %v67_v16, %v34_v17 }
  0x84   :  { %v45_v20 = vmul.f32 %v77_v18, %v41_v19 }
  0x86   :  { %46 = vadd.xlane.f32.xlu1 %v45_v20 }
  0xf9   :  { %v47_v22 = vpop.xlane.xlu1 %46 }
  0xfa   :  { %v58_v23 = vadd.f32 %v57_v21, %v47_v22 }
  0xfc   :  { %60 = vst.msk [vmem:[%s126_s4] sm:$0xff] %vm59_vm4, %v58_v23 }

</bundles_post_ra>
